<compile_context>
chip_gen: v6e
topology: v6e:2x2x1
jax: 0.10.0
libtpu: 0.0.40
codegen_flags: <defaults>
</compile_context>

<pallas_src>
import functools

import jax
import jax.numpy as jnp
from jax import lax
from jax.experimental import pallas as pl
from jax.experimental.pallas import tpu as pltpu


def _round_up(x, m):
    return ((x + m - 1) // m) * m


def _cdiv(a, b):
    return (a + b - 1) // b


# ---------------------------------------------------------------------------
# Kernel A: collapsed class grid (one class tile per row tile, 1-D grid).
# ---------------------------------------------------------------------------
def _he_loss_single_kernel(logits_ref, labels_ref, out_ref, *, s, cm):
    logits = logits_ref[...].astype(jnp.float32)        # (tm, C) upcast in-kernel
    labels = labels_ref[...]                            # (tm, 1) int32
    tm, tc = logits.shape

    iota = lax.broadcasted_iota(jnp.int32, (tm, tc), 1)
    is_target = iota == labels                          # (tm, C)

    e = jnp.exp(s * logits)
    sum_all = jnp.sum(e, axis=-1, keepdims=True)                          # (tm, 1)
    tgt = jnp.sum(jnp.where(is_target, logits, 0.0), axis=-1, keepdims=True)

    numerator = s * (tgt - cm)
    sum_other = jnp.maximum(sum_all - jnp.exp(s * tgt), 0.0)  # clamp fp cancellation
    denom = jnp.exp(numerator) + sum_other
    out_ref[...] = numerator - jnp.log(denom)


# ---------------------------------------------------------------------------
# Kernel B: tiled class grid (2-D grid, class/reduction axis last, "arbitrary").
# Lane-dense (tm, 128) accumulators; single cross-lane reduce at finalize.
# ---------------------------------------------------------------------------
def _he_loss_tiled_kernel(logits_ref, labels_ref, out_ref, tgt_acc, sum_acc,
                          *, s, cm, num_classes, mask_ragged):
    j = pl.program_id(1)
    tm, tc = logits_ref.shape                            # tc is a multiple of 128

    @pl.when(j == 0)
    def _init():
        tgt_acc[...] = jnp.zeros_like(tgt_acc)
        sum_acc[...] = jnp.zeros_like(sum_acc)

    logits = logits_ref[...].astype(jnp.float32)         # (tm, tc)
    labels = labels_ref[...]                             # (tm, 1) int32

    iota = lax.broadcasted_iota(jnp.int32, (tm, tc), 1)
    # Shift the label into this tile's local frame: (tm,1) subtract instead of a
    # full (tm,tc) add to build global column indices.
    is_target = iota == (labels - j * tc)

    e = jnp.exp(s * logits)
    if mask_ragged:
        # Ragged last class tile: columns past the true class count contribute 0.
        e = jnp.where(iota < (num_classes - j * tc), e, 0.0)
    t = jnp.where(is_target, logits, 0.0)

    # Lane-dense accumulation: add the tc//128 aligned 128-lane column blocks
    # (VALU-only); defer the cross-lane reduce to the finalize step.
    s_run = sum_acc[...]
    t_run = tgt_acc[...]
    for k in range(tc // 128):
        sl = slice(k * 128, (k + 1) * 128)
        s_run = s_run + e[:, sl]
        t_run = t_run + t[:, sl]
    sum_acc[...] = s_run
    tgt_acc[...] = t_run

    @pl.when(j == pl.num_programs(1) - 1)
    def _finalize():
        sum_all = jnp.sum(sum_acc[...], axis=-1, keepdims=True)   # (tm, 1)
        tgt = jnp.sum(tgt_acc[...], axis=-1, keepdims=True)       # (tm, 1)
        numerator = s * (tgt - cm)
        sum_other = jnp.maximum(sum_all - jnp.exp(s * tgt), 0.0)
        denom = jnp.exp(numerator) + sum_other
        out_ref[...] = numerator - jnp.log(denom)


# ---------------------------------------------------------------------------
# Wrapper
# ---------------------------------------------------------------------------
def he_loss(logits, labels, s, cm=0.0, *, block_n=512, block_c=None,
            max_stream_bytes=32 * 1024 * 1024):
    """logits: (N, C) f32 or bf16 (streamed in storage dtype), labels: (N,) int.

    Returns scalar f32 loss matching the PyTorch HELoss forward.
    """
    N, C = logits.shape
    itemsize = jnp.dtype(logits.dtype).itemsize
    if block_c is None:
        block_c = 2048 if itemsize >= 4 else 4096

    # ----- row tile: multiple of 8 (never larger than N); >= 2 tiles when possible
    if N <= 8:
        tm = N
    else:
        tm = min(_round_up(block_n, 8), (N // 8) * 8)
        if _cdiv(N, tm) < 2:
            # v7x megacore: give both TensorCores at least one row tile.
            tm = max(8, min((N // 8) * 8, _round_up(_cdiv(N, 2), 8)))
    grid_r = _cdiv(N, tm)

    labels2d = labels.astype(jnp.int32).reshape(N, 1)
    s = float(s)
    cm = float(cm)

    compiler_params = pltpu.CompilerParams(
        dimension_semantics=None,  # filled per-variant below
        vmem_limit_bytes=48 * 1024 * 1024,
    )
    cost = pl.CostEstimate(
        flops=4 * N * C,
        transcendentals=N * C,
        bytes_accessed=N * C * itemsize + 2 * N * 4,
    )

    c128 = _round_up(C, 128)
    fits = 2 * tm * c128 * itemsize <= max_stream_bytes  # double-buffered stream

    if fits:
        # ---- collapsed class grid: 1-D grid over row tiles -------------------
        per_row = pl.pallas_call(
            functools.partial(_he_loss_single_kernel, s=s, cm=cm),
            out_shape=jax.ShapeDtypeStruct((N, 1), jnp.float32),
            grid_spec=pltpu.PrefetchScalarGridSpec(
                num_scalar_prefetch=0,
                grid=(grid_r,),
                in_specs=[
                    pl.BlockSpec((tm, C), lambda i: (i, 0)),   # logits (full C)
                    pl.BlockSpec((tm, 1), lambda i: (i, 0)),   # labels
                ],
                out_specs=pl.BlockSpec((tm, 1), lambda i: (i, 0)),
            ),
            compiler_params=pltpu.CompilerParams(
                dimension_semantics=("parallel",),
                vmem_limit_bytes=48 * 1024 * 1024,
            ),
            cost_estimate=cost,
        )(logits, labels2d)
    else:
        # ---- tiled class grid: (rows, classes) with classes last -------------
        tc = min(_round_up(block_c, 128), (C // 128) * 128)
        while tc > 128 and 2 * tm * tc * itemsize > max_stream_bytes:
            tc = max(128, (tc // 2 // 128) * 128)
        grid_c = _cdiv(C, tc)
        kernel = functools.partial(
            _he_loss_tiled_kernel, s=s, cm=cm,
            num_classes=C, mask_ragged=(C % tc != 0),
        )
        per_row = pl.pallas_call(
            kernel,
            out_shape=jax.ShapeDtypeStruct((N, 1), jnp.float32),
            grid_spec=pltpu.PrefetchScalarGridSpec(
                num_scalar_prefetch=0,
                grid=(grid_r, grid_c),                         # reduction axis last
                in_specs=[
                    pl.BlockSpec((tm, tc), lambda i, j: (i, j)),  # logits tile
                    pl.BlockSpec((tm, 1), lambda i, j: (i, 0)),   # labels (resident)
                ],
                out_specs=pl.BlockSpec((tm, 1), lambda i, j: (i, 0)),
                scratch_shapes=[
                    pltpu.VMEM((tm, 128), jnp.float32),   # lane-dense target acc
                    pltpu.VMEM((tm, 128), jnp.float32),   # lane-dense sum(exp) acc
                ],
            ),
            compiler_params=pltpu.CompilerParams(
                dimension_semantics=("parallel", "arbitrary"),
                vmem_limit_bytes=48 * 1024 * 1024,
            ),
            cost_estimate=cost,
        )(logits, labels2d)

    del compiler_params  # (per-variant params used above)
    return -jnp.mean(per_row)


def he_loss_ref(logits, labels, s, cm=0.0):
    """Pure-JAX reference mirroring the PyTorch forward."""
    N, C = logits.shape
    logits = logits.astype(jnp.float32)
    target_logit = jnp.take_along_axis(logits, labels[:, None], axis=1)[:, 0]
    numerator = s * (target_logit - cm)
    onehot = jax.nn.one_hot(labels, C, dtype=bool)
    sum_other = jnp.sum(jnp.where(onehot, 0.0, jnp.exp(s * logits)), axis=1)
    denom = jnp.exp(numerator) + sum_other
    return -jnp.mean(numerator - jnp.log(denom))


if __name__ == "__main__":
    key = jax.random.PRNGKey(0)
    k1, k2, k3, k4 = jax.random.split(key, 4)

    s, cm = 16.0, 0.1

    # Test 1: default (collapsed-class) path; ragged N and C exercise partial blocks.
    N1, C1 = 45, 300
    logits1 = jax.random.uniform(k1, (N1, C1), minval=-1.0, maxval=1.0,
                                 dtype=jnp.float32)
    labels1 = jax.random.randint(k2, (N1,), 0, C1, dtype=jnp.int32)
    out1 = he_loss(logits1, labels1, s, cm)
    ref1 = he_loss_ref(logits1, labels1, s, cm)
    assert jnp.allclose(out1, ref1, rtol=1e-4, atol=1e-4), (out1, ref1)

    # Test 2: force the tiled-class (2-D grid) path, including a ragged last
    # class tile (300 % 128 != 0) and a partial last row tile.
    out2 = he_loss(logits1, labels1, s, cm, block_n=16, max_stream_bytes=16 * 1024)
    assert jnp.allclose(out2, ref1, rtol=1e-4, atol=1e-4), (out2, ref1)

    # Test 3: bf16 storage dtype streamed end-to-end (CIFAR-10-like C=10).
    N3, C3 = 32, 10
    logits3 = jax.random.uniform(k3, (N3, C3), minval=-1.0, maxval=1.0,
                                 dtype=jnp.float32).astype(jnp.bfloat16)
    labels3 = jax.random.randint(k4, (N3,), 0, C3, dtype=jnp.int32)
    out3 = he_loss(logits3, labels3, 30.0, 0.0)
    ref3 = he_loss_ref(logits3.astype(jnp.float32), labels3, 30.0, 0.0)

    jax.block_until_ready((out1, out2, out3))
    assert jnp.allclose(out3, ref3, rtol=1e-3, atol=1e-3), (out3, ref3)

    print("KERNEL_OK")
</pallas_src>

<mosaic_0001>
module attributes {stable_mosaic.version = 11 : i64} {
  func.func @_he_loss_single_kernel(%arg0: i32, %arg1: memref<40x300xf32, #tpu.memory_space<vmem>>, %arg2: memref<40x1xi32, #tpu.memory_space<vmem>>, %arg3: memref<40x1xf32, #tpu.memory_space<vmem>>) attributes {dimension_semantics = [#tpu.dimension_semantics<parallel>], iteration_bounds = array<i64: 2>, scalar_prefetch = 0 : i64, scratch_operands = 0 : i64, tpu.core_type = #tpu.core_type<tc>, window_params = [{transform_indices = @transform_0, window_bounds = array<i64: 40, 300>}, {transform_indices = @transform_1, window_bounds = array<i64: 40, 1>}, {transform_indices = @transform_2, window_bounds = array<i64: 40, 1>}]} {
    %c0 = arith.constant 0 : index
    %c0_0 = arith.constant 0 : index
    %0 = vector.load %arg1[%c0, %c0_0] : memref<40x300xf32, #tpu.memory_space<vmem>>, vector<40x300xf32>
    %c0_1 = arith.constant 0 : index
    %c0_2 = arith.constant 0 : index
    %1 = vector.load %arg2[%c0_1, %c0_2] : memref<40x1xi32, #tpu.memory_space<vmem>>, vector<40x1xi32>
    %2 = tpu.iota {dimensions = array<i32: 1>} : vector<40x300xi32>
    %3 = vector.broadcast %1 : vector<40x1xi32> to vector<40x300xi32>
    %4 = arith.cmpi eq, %2, %3 : vector<40x300xi32>
    %cst = arith.constant 1.600000e+01 : f32
    %5 = vector.broadcast %cst : f32 to vector<40x300xf32>
    %6 = arith.mulf %5, %0 : vector<40x300xf32>
    %7 = math.exp %6 : vector<40x300xf32>
    %cst_3 = arith.constant dense<0.000000e+00> : vector<40xf32>
    %8 = vector.multi_reduction <add>, %7, %cst_3 [1] : vector<40x300xf32> to vector<40xf32>
    %9 = vector.shape_cast %8 : vector<40xf32> to vector<40x1xf32>
    %cst_4 = arith.constant 0.000000e+00 : f32
    %10 = vector.broadcast %cst_4 : f32 to vector<40x300xf32>
    %11 = arith.select %4, %0, %10 : vector<40x300xi1>, vector<40x300xf32>
    %cst_5 = arith.constant dense<0.000000e+00> : vector<40xf32>
    %12 = vector.multi_reduction <add>, %11, %cst_5 [1] : vector<40x300xf32> to vector<40xf32>
    %13 = vector.shape_cast %12 : vector<40xf32> to vector<40x1xf32>
    %cst_6 = arith.constant 1.000000e-01 : f32
    %14 = vector.broadcast %cst_6 : f32 to vector<40x1xf32>
    %15 = arith.subf %13, %14 : vector<40x1xf32>
    %cst_7 = arith.constant 1.600000e+01 : f32
    %16 = vector.broadcast %cst_7 : f32 to vector<40x1xf32>
    %17 = arith.mulf %16, %15 : vector<40x1xf32>
    %cst_8 = arith.constant 1.600000e+01 : f32
    %18 = vector.broadcast %cst_8 : f32 to vector<40x1xf32>
    %19 = arith.mulf %18, %13 : vector<40x1xf32>
    %20 = math.exp %19 : vector<40x1xf32>
    %21 = arith.subf %9, %20 : vector<40x1xf32>
    %cst_9 = arith.constant 0.000000e+00 : f32
    %22 = vector.broadcast %cst_9 : f32 to vector<40x1xf32>
    %23 = arith.maximumf %21, %22 : vector<40x1xf32>
    %24 = math.exp %17 : vector<40x1xf32>
    %25 = arith.addf %24, %23 : vector<40x1xf32>
    %26 = math.log %25 : vector<40x1xf32>
    %27 = arith.subf %17, %26 : vector<40x1xf32>
    %c0_10 = arith.constant 0 : index
    %c0_11 = arith.constant 0 : index
    %28 = vector.load %arg3[%c0_10, %c0_11] : memref<40x1xf32, #tpu.memory_space<vmem>>, vector<40x1xf32>
    tpu.vector_store %arg3[%c0_10, %c0_11], %27 {strides = array<i32>} : memref<40x1xf32, #tpu.memory_space<vmem>>, vector<40x1xf32>,
    return
  }
  func.func @transform_0(%arg0: i32) -> (i32, i32) {
    %c0_i32 = arith.constant 0 : i32
    %c0_i32_0 = arith.constant 0 : i32
    return %arg0, %c0_i32 : i32, i32
  }
  func.func @transform_1(%arg0: i32) -> (i32, i32) {
    %c0_i32 = arith.constant 0 : i32
    %c0_i32_0 = arith.constant 0 : i32
    return %arg0, %c0_i32 : i32, i32
  }
  func.func @transform_2(%arg0: i32) -> (i32, i32) {
    %c0_i32 = arith.constant 0 : i32
    %c0_i32_0 = arith.constant 0 : i32
    return %arg0, %c0_i32 : i32, i32
  }
}

</mosaic_0001>

<bundles_post_ra>
// kernel: tpu_custom_call.1
= control target key start
LH: loop header
LB: loop body
LE: loop exit
PB: predicated region body
PF: predicated region fallthrough
CT: control target
= control target key end

     0   :  { %7 = vsyncpa [#allocation3], 0  ;;  %s1354_s0 = inlined_call_operand.hbm [shape: f32[45,300], index: 0, kind: input, shape index: {}]   ;;  %s1355_s1 = inlined_call_operand.vmem [shape: s32[45,1], index: 1, kind: input, shape index: {}]   ;;  %s1356_s2 = inlined_call_operand.vmem [shape: f32[45,1], index: 2, kind: output, shape index: {}]  }
   0x1   :  { %9 = vsyncpa [#allocation3 + $0x1], 0  ;;  %s1057_s9 = smov 0   ;;  %s1059_s10 = smov 0  }
   0x2   :  { %s1061_s11 = smov 0   ;;  %s1063_s12 = smov 0  }
   0x3 LB: > { %s1076_s13 = sadd.s32 4294967295, %s1004_s12   ;;  %s1079_s14 = sadd.s32 1, %s1004_s12   ;;  %s1004_s12 = sphi %s1063_s12, %s1365_s12   ;;  %s1000_s11 = sphi %s1061_s11, %s1364_s11   ;;  %s996_s10 = sphi %s1059_s10, %s1363_s10   ;;  %s992_s9 = sphi %s1057_s9, %s1362_s9  }
   0x4   : > { %s19_s15 = ssub.s32 %s1004_s12, %s1079_s14  ;;  %s22_s16 = sadd.s32 1, %s1000_s11 }
   0x5   : > { %p20_p0 = scmp.eq.s32.totalorder %s19_s15, 0  ;;  %p29_p1 = scmp.ne.s32.totalorder %s1000_s11, %s996_s10 }
   0x6   : > { %p30_p2 = scmp.eq.s32.totalorder %s1004_s12, 0  ;;  %p35_p3 = scmp.ne.s32.totalorder %s996_s10, %s992_s9 }
   0x7   : > { %s1089_s17 = scalar_select %p20_p0, %s1000_s11, %s22_s16  }
   0x8   : > { %p31_p4 = por %p30_p2, %p29_p1  ;;  %p36_p5 = scmp.eq.s32.totalorder %s1076_s13, 0 }
   0x9   : > { %p85_p6 = scmp.eq.s32.totalorder %s1076_s13, 1  ;;  %p714_p9 = scmp.ge.s32.totalorder %s1004_s12, 2 }
   0xa   : > { %p1093_p7 = por %p36_p5, %p35_p3 }
   0xb   : > { %p1097_p8 = por %p85_p6, %p29_p1  ;;  %107 = sbr.rel (%p714_p9) target bundleno = 51 (0x33), region = 16 }
  0x10   : > { %110 = sbr.rel (!%p31_p4) target bundleno = 51 (0x33), region = 20  ;;  %s111_s20 = sand.u32 (%p31_p4), 1, %s1000_s11  }
  0x11   : > { %s116_s21 = smul.u32 (%p31_p4), 5, %s1004_s12  ;;  %s1107_s26 = scalar_lea.sflag (%p31_p4), [#allocation3], %s111_s20 }
  0x12   : > { %s740_s22 = smul.u32 (%p31_p4), 120, %s111_s20 }
  0x13   : > { %s117_s23 = ssub.s32 (%p31_p4), 6, %s116_s21 }
  0x14   : > { %p118_p10 = scmp.lt.s32.totalorder (%p31_p4), %s117_s23, 5  ;;  %s115_s27 = scalar_lea.vmem (%p31_p4), [#allocation2], %s740_s22 }
  0x16   : > { %s1367_s23 = smov (!%p118_p10, %s117_s23), 5 }
  0x17   : > { %s1104_s24 = smul.u32 384, %s1367_s23 }
  0x19   : > { %s123_s25 = ssub.s32 1920, %s1104_s24 }
  0x1a   : > { %124 = vsyncadd %s1107_s26, %s123_s25  ;;  %p717_p11 = scmp.ne.s32.totalorder %s1104_s24, 0  ;;  %s745_s28 = smul.u32 1920, %s1004_s12 }
  0x1b   : > { %s130_s29 = sshll.u32 %s115_s27, 4  ;;  %s916_s8 = scalar_lea.hbm %s1354_s0, 2304  ;;  %s1117_s29 = int_to_ptr.vmem [resolvable:$true] %s130_s29 }
  0x1c   : > { %s1115_s4 = scalar_lea.hbm %s1354_s0, %s745_s28 }
  0x1d   : > { %s912_s5 = scalar_lea.hbm %s1115_s4, %s1104_s24  ;;  %p917_p1 = scmp.lt.s32.totalorder %s1115_s4, %s1354_s0 }
  0x1e   : > { %p913_p12 = scmp.ne.s32.totalorder %s1115_s4, %s912_s5  ;;  %p918_p2 = scmp.lt.s32.totalorder %s916_s8, %s912_s5 }
  0x20   : > { %p914_p13 = pnand %p913_p12, %p717_p11  ;;  %p919_p3 = por %p918_p2, %p917_p1 }
  0x22   : > { %p915_p0 = pneg %p914_p13 }
  0x24   : > { %p920_p4 = pnand %p919_p3, %p915_p0 }
  0x26   : > { %923 = shalt.err (!%p920_p4)
}
  0x27   : > { %s924_s16 = scalar_lea.vmem %s1117_s29, %s1104_s24  ;;  %s1038_s20 = smov [#allocation2]  }
  0x28   : > { %p925_p5 = scmp.ne.s32.totalorder %s1117_s29, %s924_s16  ;;  %s928_s21 = sshll.u32 %s1038_s20, 4  ;;  %s929_s21 = int_to_ptr.vmem [resolvable:$false] %s928_s21 }
  0x29   : > { %s930_s22 = scalar_lea.vmem %s929_s21, 3840  ;;  %p931_p10 = scmp.lt.s32.totalorder %s1117_s29, %s929_s21 }
  0x2a   : > { %p926_p6 = pnand %p925_p5, %p717_p11  ;;  %p932_p12 = scmp.lt.s32.totalorder %s930_s22, %s924_s16 }
  0x2c   : > { %p927_p9 = pneg %p926_p6  ;;  %p933_p13 = por %p932_p12, %p931_p10 }
  0x2e   : > { %p934_p1 = pnand %p933_p13, %p927_p9 }
  0x30   : > { %937 = shalt.err (!%p934_p1)
}
  0x31   : > { %s1039_s23 = smov 384   ;;  %s1040_s25 = smov 24  }
  0x32   : > { %136 = dma.hbm_to_vmem [thread:$0]  (%p717_p11), %s1115_s4, %s1104_s24, %s1117_s29, %s1107_s26, %s1039_s23, %s1039_s23, %s1040_s25  }
  0x33 PF: > { %p720_p0 = scmp.ge.s32.totalorder %s1004_s12, 1  ;;  %p155_p2 = scmp.lt.s32.totalorder %s1004_s12, 3 }
  0x35   : > { %p156_p3 = pnand %p720_p0, %p155_p2 }
  0x36   : > { %s1146_s27 = sand.u32 (!%p156_p3), 1, %s996_s10  }
  0x37   : > { %159 = sbr.rel (%p156_p3) target bundleno = 447 (0x1bf), region = 28  ;;  %s162_s30 = scalar_lea.sflag (!%p156_p3), [#allocation3], %s1146_s27 }
  0x38   : > { %s742_s28 = smul.u32 (!%p156_p3), 120, %s1146_s27 }
  0x3a   : > { %s1150_s3 = scalar_lea.vmem (!%p156_p3), [#allocation2], %s742_s28 }
  0x3c   : > { %987 = dma.done.wait (%p1093_p7), %s162_s30, 1920  }
  0x3d   : > { %989 = vsyncadd (%p1093_p7), %s162_s30, 4294965376  ;;  %s1157_s24 = smul.u32 5, %s1076_s13  ;;  %v1041_v0 = vmov 0   ;;  %v1165_v6 = vld [vmem:[%s1150_s3 + $0x8] sm:$0xff]  ;;  %v1168_v7 = vld [vmem:[%s1150_s3] sm:$0xff]  ;;  %v239_v39 = vlaneseq  ;;  %vm319_vm0 = vcmask 359424  }
  0x3e   : > { %847 = vset.pattern.permute.xlu1 %v1041_v0  ;;  %846 = vset.pattern.permute.xlu0 %v1041_v0  ;;  %v1171_v8 = vld [vmem:[%s1150_s3 + $0x10] sm:$0xff]  ;;  %v274_v9 = vmul.f32 16.0, %v1165_v6  ;;  %v273_v11 = vmul.f32 16.0, %v1168_v7  ;;  %v1177_v13 = vld [vmem:[%s1150_s3 + $0x20] sm:$0xff]  ;;  %v1180_v15 = vld [vmem:[%s1150_s3 + $0x28] sm:$0xff]  ;;  %s743_s18 = smul.u32 40, %s1146_s27 }
  0x3f   : > { %p205_p11 = scmp.lt.s32.totalorder %s1157_s24, 5  ;;  %v275_v10 = vmul.f32 16.0, %v1171_v8  ;;  %v1183_v17 = vld [vmem:[%s1150_s3 + $0x18] sm:$0xff]  ;;  %v277_v18 = vmul.f32 16.0, %v1177_v13  ;;  %v1187_v19 = vld [vmem:[%s1150_s3 + $0x48] sm:$0xff]  ;;  %v278_v20 = vmul.f32 16.0, %v1180_v15 }
  0x40   : > { %v290_v12 = vmul.f32 1.442695, %v274_v9  ;;  %v288_v16 = vmul.f32 1.442695, %v273_v11  ;;  %v1191_v21 = vld [vmem:[%s1150_s3 + $0x50] sm:$0xff]  ;;  %v276_v22 = vmul.f32 16.0, %v1183_v17 }
  0x41   : > { %s206_s12 = scalar_select %p205_p11, %s1157_s24, 5  ;;  %v292_v14 = vmul.f32 1.442695, %v275_v10  ;;  %v1195_v23 = vld [vmem:[%s1150_s3 + $0x58] sm:$0xff]  ;;  %v282_v24 = vmul.f32 16.0, %v1187_v19  ;;  %v283_v26 = vmul.f32 16.0, %v1191_v21 }
  0x42   : > { %848 = vpow2.f32 %v290_v12  ;;  %v296_v25 = vmul.f32 1.442695, %v277_v18  ;;  %v298_v27 = vmul.f32 1.442695, %v278_v20  ;;  %v284_v28 = vmul.f32 16.0, %v1195_v23  ;;  %v225_v29 = vld [vmem:[%s1150_s3 + $0x30] sm:$0xff] }
  0x43   : > { %s721_s26 = sshll.u32 %s206_s12, 3  ;;  %850 = vpow2.f32 %v292_v14  ;;  %v294_v30 = vmul.f32 1.442695, %v276_v22  ;;  %v226_v31 = vld [vmem:[%s1150_s3 + $0x38] sm:$0xff]  ;;  %v279_v32 = vmul.f32 16.0, %v225_v29  ;;  %v227_v34 = vld [vmem:[%s1150_s3 + $0x40] sm:$0xff] }
  0x44   : > { %s208_s5 = scalar_lea.vmem %s1355_s1, %s721_s26  ;;  %852 = vpow2.f32 %v288_v16  ;;  %v306_v33 = vmul.f32 1.442695, %v282_v24  ;;  %v280_v35 = vmul.f32 16.0, %v226_v31  ;;  %v308_v36 = vmul.f32 1.442695, %v283_v26  ;;  %v1204_v38 = vld [vmem:[%s1150_s3 + $0x60] sm:$0xff] }
  0x45   : > { %v236_v1 = vld [vmem:[%s208_s5 + $0x10] sm:$0xff]  ;;  %v234_v2 = vld [vmem:[%s208_s5] sm:$0xff]  ;;  %v237_v3 = vld [vmem:[%s208_s5 + $0x18] sm:$0xff]  ;;  %854 = vpow2.f32 %v296_v25  ;;  %v281_v37 = vmul.f32 16.0, %v227_v34  ;;  %v310_v40 = vmul.f32 1.442695, %v284_v28 }
  0x46   : > { %250 = vperm.xlu1 %847, %v236_v1   ;;  %244 = vperm.xlu0 %846, %v234_v2   ;;  %v235_v4 = vld [vmem:[%s208_s5 + $0x8] sm:$0xff]  ;;  %v238_v5 = vld [vmem:[%s208_s5 + $0x20] sm:$0xff]  ;;  %856 = vpow2.f32 %v298_v27  ;;  %v285_v42 = vmul.f32 16.0, %v1204_v38  ;;  %v300_v43 = vmul.f32 1.442695, %v279_v32  ;;  %v1215_v49 = vand.u32 127, %v239_v39 }
  0x47   : > { %v1207_v41 = vld [vmem:[%s1150_s3 + $0x68] sm:$0xff]  ;;  %858 = vpow2.f32 %v294_v30  ;;  %v1211_v44 = vld [vmem:[%s1150_s3 + $0x70] sm:$0xff]  ;;  %v302_v46 = vmul.f32 1.442695, %v280_v35  ;;  %v304_v48 = vmul.f32 1.442695, %v281_v37 }
  0x48   : > { %v286_v45 = vmul.f32 16.0, %v1207_v41  ;;  %860 = vpow2.f32 %v306_v33  ;;  %v287_v47 = vmul.f32 16.0, %v1211_v44  ;;  %v312_v50 = vmul.f32 1.442695, %v285_v42  ;;  %s1279_s6 = scalar_lea.vmem [#allocation4], %s743_s18   ;;  %s463_s7 = ssub.s32 (%p1097_p8), 6, %s1157_s24 }
  0x49   : > { %862 = vpow2.f32 %v308_v36  ;;  %v1218_v56 = vadd.s32 128, %v1215_v49  ;;  %v1221_v57 = vadd.s32 256, %v1215_v49  ;;  %s739_s8 = smul.u32 (%p1097_p8), 40, %s1076_s13  ;;  %p464_p7 = scmp.lt.s32.totalorder (%p1097_p8), %s463_s7, 5 }
  0x4a   : > { %253 = vperm.xlu1 %847, %v237_v3   ;;  %247 = vperm.xlu0 %846, %v235_v4   ;;  %864 = vpow2.f32 %v310_v40  ;;  %v314_v52 = vmul.f32 1.442695, %v286_v45  ;;  %v316_v54 = vmul.f32 1.442695, %v287_v47 }
  0x4b   : > { %866 = vpow2.f32 %v300_v43  ;;  %s1302_s16 = scalar_lea.vmem (%p1097_p8), %s1356_s2, %s739_s8  }
  0x4c   : > { %868 = vpow2.f32 %v302_v46 }
  0x4d   : > { %870 = vpow2.f32 %v304_v48 }
  0x4e   : > { %256 = vperm.xlu0 %846, %v238_v5   ;;  %872 = vpow2.f32 %v312_v50 }
  0x4f   : > { %v849_v51 = vpop.eup %848  ;;  %874 = vpow2.f32 %v314_v52 }
  0x50   : > { %v851_v53 = vpop.eup %850  ;;  %876 = vpow2.f32 %v316_v54 }
  0x51   : > { %v853_v55 = vpop.eup %852  ;;  %v320_v61 = vsel %vm319_vm0, %v851_v53, 0.0 }
  0x52   : > { %v318_v60 = vadd.f32 %v853_v55, %v849_v51  ;;  %v855_v62 = vpop.eup %854 }
  0x53   : > { %v857_v1 = vpop.eup %856 }
  0x54   : > { %v859_v9 = vpop.eup %858  ;;  %v321_v40 = vadd.f32 %v320_v61, %v318_v60 }
  0x55   : > { %v861_v20 = vpop.eup %860  ;;  %v324_v48 = vadd.f32 %v859_v9, %v855_v62 }
  0xc1   : > { %v251_v58 = vpop.permute.xlu1 %250  ;;  %v245_v59 = vpop.permute.xlu0 %244 }
  0xc2   : > { %vm264_vm1 = vcmp.eq.s32.totalorder %v1215_v49, %v251_v58  ;;  %vm265_vm2 = vcmp.eq.s32.totalorder %v1218_v56, %v251_v58  ;;  %vm266_vm3 = vcmp.eq.s32.totalorder %v1221_v57, %v251_v58  ;;  %vm258_vm4 = vcmp.eq.s32.totalorder %v1215_v49, %v245_v59 }
  0xc3   : > { %vm259_vm5 = vcmp.eq.s32.totalorder %v1218_v56, %v245_v59  ;;  %vm260_vm6 = vcmp.eq.s32.totalorder %v1221_v57, %v245_v59  ;;  %v344_v63 = vsel %vm258_vm4, %v1168_v7, 0.0  ;;  %v350_v0 = vsel %vm264_vm1, %v225_v29, 0.0 }
  0xc4   : > { %v345_v2 = vsel %vm259_vm5, %v1165_v6, 0.0  ;;  %v346_v3 = vsel %vm260_vm6, %v1171_v8, 0.0  ;;  %v351_v4 = vsel %vm265_vm2, %v226_v31, 0.0  ;;  %v352_v5 = vsel %vm266_vm3, %v227_v34, 0.0  ;;  %v863_v6 = vpop.eup %862 }
  0xc5   : > { %v254_v10 = vpop.permute.xlu1 %253  ;;  %v248_v11 = vpop.permute.xlu0 %247  ;;  %v359_v12 = vadd.f32 %v345_v2, %v344_v63  ;;  %v360_v14 = vsel %vm319_vm0, %v346_v3, 0.0  ;;  %v369_v16 = vadd.f32 %v351_v4, %v350_v0  ;;  %v370_v18 = vsel %vm319_vm0, %v352_v5, 0.0 }
  0xc6   : > { %vm267_vm7 = vcmp.eq.s32.totalorder %v1215_v49, %v254_v10  ;;  %vm268_vm8 = vcmp.eq.s32.totalorder %v1218_v56, %v254_v10  ;;  %vm269_vm9 = vcmp.eq.s32.totalorder %v1221_v57, %v254_v10  ;;  %vm261_vm10 = vcmp.eq.s32.totalorder %v1215_v49, %v248_v11  ;;  %v865_v22 = vpop.eup %864 }
  0xc7   : > { %vm262_vm11 = vcmp.eq.s32.totalorder %v1218_v56, %v248_v11  ;;  %vm263_vm12 = vcmp.eq.s32.totalorder %v1221_v57, %v248_v11  ;;  %v361_v7 = vadd.f32 %v360_v14, %v359_v12  ;;  %v347_v8 = vsel %vm261_vm10, %v1183_v17, 0.0  ;;  %v867_v28 = vpop.eup %866 }
  0xc8   : > { %v348_v24 = vsel %vm262_vm11, %v1177_v13, 0.0  ;;  %v349_v25 = vsel %vm263_vm12, %v1180_v15, 0.0  ;;  %v353_v26 = vsel %vm267_vm7, %v1187_v19, 0.0  ;;  %v354_v27 = vsel %vm268_vm8, %v1191_v21, 0.0  ;;  %v869_v33 = vpop.eup %868 }
  0xc9   : > { %362 = vadd.xlane.f32.xlu1 %v361_v7  ;;  %v257_v29 = vpop.permute.xlu0 %256  ;;  %v364_v30 = vadd.f32 %v348_v24, %v347_v8  ;;  %v365_v31 = vsel %vm319_vm0, %v349_v25, 0.0  ;;  %v355_v32 = vsel %vm269_vm9, %v1195_v23, 0.0  ;;  %v374_v17 = vadd.f32 %v354_v27, %v353_v26  ;;  %v871_v15 = vpop.eup %870 }
  0xca   : > { %vm270_vm13 = vcmp.eq.s32.totalorder %v1215_v49, %v257_v29  ;;  %vm271_vm14 = vcmp.eq.s32.totalorder %v1218_v56, %v257_v29  ;;  %vm272_vm15 = vcmp.eq.s32.totalorder %v1221_v57, %v257_v29  ;;  %v375_v13 = vsel %vm319_vm0, %v355_v32, 0.0  ;;  %v873_v34 = vpop.eup %872 }
  0xcb   : > { %v366_v19 = vadd.f32 %v365_v31, %v364_v30  ;;  %v376_v21 = vadd.f32 %v375_v13, %v374_v17  ;;  %v356_v35 = vsel %vm270_vm13, %v1204_v38, 0.0  ;;  %v357_v36 = vsel %vm271_vm14, %v1207_v41, 0.0  ;;  %v875_v37 = vpop.eup %874 }
  0xcc   : > { %v371_v23 = vadd.f32 %v370_v18, %v369_v16  ;;  %v358_v39 = vsel %vm272_vm15, %v1211_v44, 0.0  ;;  %v329_v42 = vadd.f32 %v869_v33, %v867_v28  ;;  %v877_v43 = vpop.eup %876  ;;  %v330_v45 = vsel %vm319_vm0, %v871_v15, 0.0 }
  0xcd   : > { %367 = vadd.xlane.f32.xlu0 %v366_v19  ;;  %377 = vadd.xlane.f32.xlu1 %v376_v21  ;;  %v379_v46 = vadd.f32 %v357_v36, %v356_v35  ;;  %v380_v47 = vsel %vm319_vm0, %v358_v39, 0.0  ;;  %v339_v49 = vadd.f32 %v875_v37, %v873_v34  ;;  %v325_v41 = vsel %vm319_vm0, %v857_v1, 0.0 }
  0xce   : > { %v331_v38 = vadd.f32 %v330_v45, %v329_v42  ;;  %v340_v50 = vsel %vm319_vm0, %v877_v43, 0.0  ;;  %v326_v44 = vadd.f32 %v325_v41, %v324_v48  ;;  %v334_v52 = vadd.f32 %v863_v6, %v861_v20 }
  0xcf   : > { %v381_v51 = vadd.f32 %v380_v47, %v379_v46  ;;  %v341_v53 = vadd.f32 %v340_v50, %v339_v49  ;;  %v335_v54 = vsel %vm319_vm0, %v865_v22, 0.0  ;;  %vm449_vm0 = vcmask 7168  }
  0xd0   : > { %v336_v55 = vadd.f32 %v335_v54, %v334_v52 }
  0xd1   : > { %372 = vadd.xlane.f32.xlu0 %v371_v23  ;;  %322 = vadd.xlane.f32.xlu1 %v321_v40 }
  0xd5   : > { %382 = vadd.xlane.f32.xlu0 %v381_v51  ;;  %332 = vadd.xlane.f32.xlu1 %v331_v38 }
  0xd9   : > { %327 = vadd.xlane.f32.xlu0 %v326_v44  ;;  %342 = vadd.xlane.f32.xlu1 %v341_v53 }
  0xdd   : > { %337 = vadd.xlane.f32.xlu0 %v336_v55 }
 0x152   : > { %v363_v56 = vpop.xlane.xlu1 %362 }
 0x153   : > { %v722_v57 = vadd.f32 -0.1, %v363_v56  ;;  %v394_v58 = vmul.f32 16.0, %v363_v56 }
 0x155   : > { %v1262_v59 = vmul.f32 16.0, %v722_v57  ;;  %v399_v60 = vmul.f32 1.442695, %v394_v58 }
 0x156   : > { %v368_v61 = vpop.xlane.xlu0 %367  ;;  %v378_v62 = vpop.xlane.xlu1 %377 }
 0x157   : > { %878 = vpow2.f32 %v399_v60  ;;  %v419_v63 = vmul.f32 1.442695, %v1262_v59  ;;  %v723_v0 = vadd.f32 -0.1, %v368_v61  ;;  %v395_v1 = vmul.f32 16.0, %v368_v61 }
 0x158   : > { %v725_v2 = vadd.f32 -0.1, %v378_v62  ;;  %v397_v3 = vmul.f32 16.0, %v378_v62 }
 0x159   : > { %v1265_v4 = vmul.f32 16.0, %v723_v0  ;;  %v401_v5 = vmul.f32 1.442695, %v395_v1  ;;  %880 = vpow2.f32 %v419_v63 }
 0x15a   : > { %v1267_v9 = vmul.f32 16.0, %v725_v2  ;;  %v405_v10 = vmul.f32 1.442695, %v397_v3  ;;  %v373_v11 = vpop.xlane.xlu0 %372  ;;  %v323_v28 = vpop.xlane.xlu1 %322 }
 0x15b   : > { %882 = vpow2.f32 %v401_v5  ;;  %v421_v12 = vmul.f32 1.442695, %v1265_v4  ;;  %v724_v14 = vadd.f32 -0.1, %v373_v11  ;;  %v396_v16 = vmul.f32 16.0, %v373_v11 }
 0x15c   : > { %884 = vpow2.f32 %v405_v10  ;;  %v425_v18 = vmul.f32 1.442695, %v1267_v9 }
 0x15d   : > { %886 = vpow2.f32 %v421_v12  ;;  %v1271_v20 = vmul.f32 16.0, %v724_v14  ;;  %v403_v6 = vmul.f32 1.442695, %v396_v16 }
 0x15e   : > { %888 = vpow2.f32 %v425_v18  ;;  %v383_v7 = vpop.xlane.xlu0 %382  ;;  %v333_v15 = vpop.xlane.xlu1 %332 }
 0x15f   : > { %890 = vpow2.f32 %v403_v6  ;;  %v423_v8 = vmul.f32 1.442695, %v1271_v20  ;;  %v726_v22 = vadd.f32 -0.1, %v383_v7  ;;  %v398_v24 = vmul.f32 16.0, %v383_v7 }
 0x161   : > { %v1274_v25 = vmul.f32 16.0, %v726_v22  ;;  %v407_v26 = vmul.f32 1.442695, %v398_v24  ;;  %892 = vpow2.f32 %v423_v8 }
 0x162   : > { %v328_v27 = vpop.xlane.xlu0 %327  ;;  %v343_v46 = vpop.xlane.xlu1 %342 }
 0x163   : > { %894 = vpow2.f32 %v407_v26  ;;  %v427_v29 = vmul.f32 1.442695, %v1274_v25 }
 0x164   : > { %v879_v30 = vpop.eup %878 }
 0x165   : > { %v409_v31 = vsub.f32 %v323_v28, %v879_v30  ;;  %896 = vpow2.f32 %v427_v29 }
 0x166   : > { %v881_v32 = vpop.eup %880  ;;  %v338_v33 = vpop.xlane.xlu0 %337 }
 0x167   : > { %v414_v17 = vmax.f32 %v409_v31, 0.0 }
 0x168   : > { %v883_v13 = vpop.eup %882 }
 0x169   : > { %v885_v19 = vpop.eup %884  ;;  %v410_v21 = vsub.f32 %v328_v27, %v883_v13  ;;  %v429_v34 = vadd.f32 %v881_v32, %v414_v17 }
 0x16a   : > { %v887_v35 = vpop.eup %886  ;;  %v412_v36 = vsub.f32 %v338_v33, %v885_v19 }
 0x16b   : > { %v889_v37 = vpop.eup %888  ;;  %v415_v23 = vmax.f32 %v410_v21, 0.0  ;;  %898 = vlog2.f32 %v429_v34 }
 0x16c   : > { %v891_v39 = vpop.eup %890  ;;  %v417_v40 = vmax.f32 %v412_v36, 0.0 }
 0x16d   : > { %v430_v42 = vadd.f32 %v887_v35, %v415_v23  ;;  %v411_v43 = vsub.f32 %v333_v15, %v891_v39 }
 0x16e   : > { %v432_v45 = vadd.f32 %v889_v37, %v417_v40  ;;  %v893_v47 = vpop.eup %892 }
 0x16f   : > { %900 = vlog2.f32 %v430_v42  ;;  %v416_v48 = vmax.f32 %v411_v43, 0.0 }
 0x170   : > { %v895_v38 = vpop.eup %894  ;;  %902 = vlog2.f32 %v432_v45 }
 0x171   : > { %v431_v49 = vadd.f32 %v893_v47, %v416_v48  ;;  %v413_v41 = vsub.f32 %v343_v46, %v895_v38 }
 0x172   : > { %v897_v51 = vpop.eup %896 }
 0x173   : > { %904 = vlog2.f32 %v431_v49  ;;  %v418_v50 = vmax.f32 %v413_v41, 0.0 }
 0x175   : > { %v433_v44 = vadd.f32 %v897_v51, %v418_v50 }
 0x177   : > { %906 = vlog2.f32 %v433_v44 }
 0x178   : > { %v899_v52 = vpop.eup %898 }
 0x179   : > { %v435_v53 = vmul.f32 0.6931472, %v899_v52 }
 0x17b   : > { %v444_v54 = vsub.f32 %v1262_v59, %v435_v53 }
 0x17c   : > { %v901_v55 = vpop.eup %900 }
 0x17d   : > { %v903_v56 = vpop.eup %902  ;;  %v437_v57 = vmul.f32 0.6931472, %v901_v55  ;;  %450 = vst.msk [vmem:[%s1279_s6] sm:$0xff] %vm449_vm0, %v444_v54 }
 0x17e   : > { %v441_v58 = vmul.f32 0.6931472, %v903_v56 }
 0x17f   : > { %v445_v60 = vsub.f32 %v1265_v4, %v437_v57 }
 0x180   : > { %v905_v61 = vpop.eup %904  ;;  %v447_v62 = vsub.f32 %v1267_v9, %v441_v58 }
 0x181   : > { %451 = vst.msk [vmem:[%s1279_s6 + $0x8] sm:$0xff] %vm449_vm0, %v445_v60  ;;  %v439_v59 = vmul.f32 0.6931472, %v905_v61 }
 0x182   : > { %453 = vst.msk [vmem:[%s1279_s6 + $0x18] sm:$0xff] %vm449_vm0, %v447_v62 }
 0x183   : > { %v446_v63 = vsub.f32 %v1271_v20, %v439_v59 }
 0x184   : > { %v907_v0 = vpop.eup %906 }
 0x185   : > { %452 = vst.msk [vmem:[%s1279_s6 + $0x10] sm:$0xff] %vm449_vm0, %v446_v63  ;;  %v443_v1 = vmul.f32 0.6931472, %v907_v0  ;;  %461 = sbr.rel (!%p1097_p8) target bundleno = 447 (0x1bf), region = 36 }
 0x187   : > { %v448_v2 = vsub.f32 %v1274_v25, %v443_v1 }
 0x189   : > { %454 = vst.msk [vmem:[%s1279_s6 + $0x20] sm:$0xff] %vm449_vm0, %v448_v2 }
 0x18a   : > { %s1369_s7 = smov (!%p464_p7, %s463_s7), 5 }
 0x18b   : > { %s727_s20 = sshll.u32 %s1369_s7, 7 }
 0x18c   : > { %p730_p4 = scmp.eq.s32.totalorder %s727_s20, 0 }
 0x18d   : > { %908 = sdivrem.u32 (!%p730_p4), %s1369_s7, 5 }
 0x18e   : > { %472 = sbr.rel (%p730_p4) target bundleno = 447 (0x1bf), region = 40 }
 0x196   : > { %s1308_s19 = spop.drf %908 }
 0x197   : > { %p731_p8 = scmp.le.s32.totalorder %s1308_s19, 0 }
 0x198   : > { %s1359_s13 = smov (!%p731_p8), %s1302_s16  ;;  %s1360_s21 = smov (!%p731_p8), %s1279_s6 }
 0x199   : > { %659 = sbr.rel (%p731_p8) target bundleno = 422 (0x1a6), region = 125  ;;  %s1317_s22 = smov (!%p731_p8), 0  }
 0x19a   : > { %s1319_s23 = smov (!%p731_p8), 0  }
 0x19e LB: >> { %v545_v3 = vld [vmem:[%s1012_s21] sm:$0xff]  ;;  %v547_v4 = vld [vmem:[%s1012_s21 + $0x8] sm:$0xff]  ;;  %v549_v5 = vld [vmem:[%s1012_s21 + $0x10] sm:$0xff]  ;;  %s555_s25 = sadd.s32 1, %s1016_s22  ;;  %s539_s23 = sadd.s32 1, %s1020_s23   ;;  %s1020_s23 = sphi %s1319_s23, %s539_s23   ;;  %s1016_s22 = sphi %s1317_s22, %s1361_s22   ;;  %s1012_s21 = sphi %s1360_s21, %s560_s21   ;;  %s1008_s13 = sphi %s1359_s13, %s561_s13  }
 0x19f   : >> { %546 = vst [vmem:[%s1008_s13] sm:$0xff] %v545_v3  ;;  %548 = vst [vmem:[%s1008_s13 + $0x8] sm:$0xff] %v547_v4  ;;  %v551_v9 = vld [vmem:[%s1012_s21 + $0x18] sm:$0xff]  ;;  %v553_v10 = vld [vmem:[%s1012_s21 + $0x20] sm:$0xff]  ;;  %p556_p5 = scmp.ge.s32.totalorder %s555_s25, %s1308_s19  ;;  %p538_p6 = scmp.ge.s32.totalorder %s539_s23, %s1308_s19 }
 0x1a0   : >> { %550 = vst [vmem:[%s1008_s13 + $0x10] sm:$0xff] %v549_v5  ;;  %552 = vst [vmem:[%s1008_s13 + $0x18] sm:$0xff] %v551_v9 }
 0x1a1   : >> { %554 = vst [vmem:[%s1008_s13 + $0x20] sm:$0xff] %v553_v10  ;;  %s1371_s25 = smov (%p556_p5, %s555_s25), 0  ;;  %541 = sbr.rel (!%p538_p6) target bundleno = 414 (0x19e), region = 131 }
 0x1a2   : >> { %s558_s27 = smul.u32 40, %s1371_s25  ;;  %s1361_s22 = smov %s1371_s25 }
 0x1a4   : >> { %s560_s21 = scalar_lea.vmem %s1279_s6, %s558_s27 [#allocation4]   ;;  %s561_s13 = scalar_lea.vmem %s1302_s16, %s558_s27  }
 0x1a6 PF: > { %910 = sdivrem.u32 %s1369_s7, 5 }
 0x1a7   : > { %s732_s28 = smul.u32 40, %s1308_s19 }
 0x1a9   : > { %s566_s30 = scalar_lea.vmem %s1279_s6, %s732_s28 [#allocation4]   ;;  %s568_s3 = scalar_lea.vmem %s1302_s16, %s732_s28  }
 0x1af   : > { %s911_s24 = spop.drf %910 }
 0x1b0   : > { %p734_p9 = scmp.le.s32.totalorder %s911_s24, 0 }
 0x1b1   : > { %s1022_s12 = smov (!%p734_p9), %s568_s3   ;;  %s1026_s26 = smov (!%p734_p9), %s566_s30  }
 0x1b2   : > { %673 = sbr.rel (%p734_p9) target bundleno = 447 (0x1bf), region = 136  ;;  %s1030_s29 = smov (!%p734_p9), 0  }
 0x1b3   : > { %s1034_s4 = smov (!%p734_p9), 0  }
 0x1b7 LB: >> { %v578_v11 = vld [vmem:[%s1028_s26] sm:$0xff]  ;;  %s580_s5 = sadd.s32 1, %s1032_s29  ;;  %s572_s4 = sadd.s32 1, %s1036_s4   ;;  %s1036_s4 = sphi %s1034_s4, %s572_s4   ;;  %s1032_s29 = sphi %s1030_s29, %s1031_s29   ;;  %s1028_s26 = sphi %s1026_s26, %s585_s26   ;;  %s1024_s12 = sphi %s1022_s12, %s586_s12  }
 0x1b8   : >> { %579 = vst [vmem:[%s1024_s12] sm:$0xff] %v578_v11  ;;  %p581_p10 = scmp.ge.s32.totalorder %s580_s5, %s911_s24  ;;  %p571_p12 = scmp.ge.s32.totalorder %s572_s4, %s911_s24 }
 0x1ba   : >> { %s1373_s5 = smov (%p581_p10, %s580_s5), 0  ;;  %574 = sbr.rel (!%p571_p12) target bundleno = 439 (0x1b7), region = 142 }
 0x1bb   : >> { %s735_s18 = sshll.u32 %s1373_s5, 3  ;;  %s1031_s29 = smov %s1373_s5  }
 0x1bc   : >> { %s585_s26 = scalar_lea.vmem %s566_s30, %s735_s18 [#allocation4]   ;;  %s586_s12 = scalar_lea.vmem %s568_s3, %s735_s18  }
 0x1bf PF: > { %p12_p13 = scmp.ge.s32.totalorder %s1079_s14, 4   ;;  %s1362_s9 = smov %s996_s10 }
 0x1c0   : > { %s1363_s10 = smov %s1000_s11  ;;  %s1364_s11 = smov %s1089_s17 }
 0x1c1   : > { %s1365_s12 = smov %s1079_s14  ;;  %14 = sbr.rel (!%p12_p13) target bundleno = 3 (0x3), region = 153 }
 0x1c6   :  { %602 = vsyncpa [#allocation3], 1 }
 0x1c7   :  { %604 = vsyncpa [#allocation3 + $0x1], 1 }

</bundles_post_ra>
